<compile_context>
chip_gen: v5e
topology: v5e:2x2
jax: 0.10.0
libtpu: 0.0.40
codegen_flags: <defaults>
</compile_context>

<pallas_src>
import math

import jax
import jax.numpy as jnp
from jax.experimental import pallas as pl
from jax.experimental.pallas import tpu as pltpu


def _mlp_link_kernel(src_ref, dst_ref, xt_ref, w1t_ref, b1_ref, w2f_ref,
                     b2f_ref, out_ref):
    # src_ref, dst_ref: (1, TL) int32 node indices for this tile of links
    # xt_ref:  (D,  N)   node embeddings, transposed, VMEM-resident
    # w1t_ref: (H1, D)   layer-1 weight, pre-transposed
    # b1_ref:  (H1, 1)   layer-1 bias column (broadcast over links/lanes)
    # w2f_ref: (H1, 1)   fused (layer2 @ head) weight column
    # b2f_ref: (1,)      fused scalar bias, in SMEM
    # out_ref: (1,  TL)  lane-dense logits row
    n = xt_ref.shape[1]
    tl = src_ref.shape[1]

    # In-kernel gather via one-hot MXU matmuls (exact with f32 one-hot).
    iota = jax.lax.broadcasted_iota(jnp.int32, (n, tl), 0)
    onehot_src = (iota == src_ref[...]).astype(jnp.float32)       # (N, TL)
    onehot_dst = (iota == dst_ref[...]).astype(jnp.float32)       # (N, TL)
    xs = jnp.dot(xt_ref[...], onehot_src,
                 preferred_element_type=jnp.float32)              # (D, TL)
    xd = jnp.dot(xt_ref[...], onehot_dst,
                 preferred_element_type=jnp.float32)              # (D, TL)
    h = xs * xd                                                   # hadamard

    # Layer 1 (MXU) + ReLU.
    z = jnp.dot(w1t_ref[...], h, preferred_element_type=jnp.float32)
    z = jnp.maximum(z + b1_ref[...], 0.0)                         # (H1, TL)

    # Fused layer-2 + head: VPU multiply + sublane reduction.
    logits = jnp.sum(z * w2f_ref[...], axis=0, keepdims=True)     # (1, TL)
    out_ref[...] = logits + b2f_ref[0]


def _round_up(v, m):
    return ((v + m - 1) // m) * m


def _choose_tile_links(num_links, num_nodes, d, h1, *,
                       max_tile=32768, vmem_budget=12 * 1024 * 1024,
                       min_tiles=4):
    """Pick a link-tile size: big enough to amortize the ~0.35us/step fixed
    overhead, small enough for the in-kernel intermediates (one-hots dominate)
    to fit VMEM and for the grid to keep >= min_tiles steps (v7x megacore)."""
    bytes_per_link = 4 * (2 * max(num_nodes, 8) + 3 * d + h1 + 16)
    cap_vmem = max(128, (vmem_budget // bytes_per_link) // 128 * 128)
    cap_tiles = max(128, _round_up(-(-num_links // min_tiles), 128))
    return max(128, min(max_tile, cap_vmem, cap_tiles))


@jax.jit
def mlp_link_predictor(x, src, dst, params):
    """Pallas forward of MLPLinkPredictor. Returns logits of shape (num_links,)."""
    w1, b1, w2, b2, wf, bf = params
    N, D = x.shape
    H1 = w1.shape[1]
    L = src.shape[0]

    # The node table must fit comfortably in VMEM for the in-kernel gather.
    # TODO(synk): for node tables larger than a few MiB, fall back to streaming
    # bf16 (D, tile) hadamard tiles from HBM instead of a resident x^T.
    assert N * D * 4 <= 8 * 1024 * 1024, "node table too large for VMEM-resident gather"

    # Fold hidden layer 2 into the 1-wide head (no nonlinearity between them).
    w2f = w2 @ wf                              # (H1, 1)
    b2f = (b2 @ wf + bf).reshape(1)            # (1,) scalar fused bias

    tile_links = _choose_tile_links(L, N, D, H1)
    num_tiles = -(-L // tile_links)
    L_pad = num_tiles * tile_links

    # Pad the cheap int32 index streams (not a (D, L) f32 array): padded lanes
    # deterministically gather node 0 and are sliced off below.
    src_i = src.astype(jnp.int32)
    dst_i = dst.astype(jnp.int32)
    if L_pad != L:
        src_i = jnp.pad(src_i, (0, L_pad - L))
        dst_i = jnp.pad(dst_i, (0, L_pad - L))
    src2d = src_i.reshape(1, L_pad)
    dst2d = dst_i.reshape(1, L_pad)

    xt = x.T                                    # (D, N)  tiny, resident
    w1t = w1.T                                  # (H1, D)
    b1_col = b1.T                               # (H1, 1)

    out = pl.pallas_call(
        _mlp_link_kernel,
        out_shape=jax.ShapeDtypeStruct((1, L_pad), jnp.float32),
        grid_spec=pltpu.PrefetchScalarGridSpec(
            num_scalar_prefetch=0,
            grid=(num_tiles,),
            in_specs=[
                pl.BlockSpec((1, tile_links), lambda i: (0, i)),   # src tile
                pl.BlockSpec((1, tile_links), lambda i: (0, i)),   # dst tile
                pl.BlockSpec((D, N), lambda i: (0, 0)),            # x^T (resident)
                pl.BlockSpec((H1, D), lambda i: (0, 0)),           # W1^T (resident)
                pl.BlockSpec((H1, 1), lambda i: (0, 0)),           # b1 column
                pl.BlockSpec((H1, 1), lambda i: (0, 0)),           # fused W2f column
                pl.BlockSpec(memory_space=pltpu.MemorySpace.SMEM), # fused scalar bias
            ],
            out_specs=pl.BlockSpec((1, tile_links), lambda i: (0, i)),
        ),
        compiler_params=pltpu.CompilerParams(
            dimension_semantics=("parallel",),
            vmem_limit_bytes=32 * 1024 * 1024,
        ),
    )(src2d, dst2d, xt, w1t, b1_col, w2f, b2f)

    return out[0, :L]                           # drop padding, shape (L,)


def init_params(key, node_dim, layer_widths, pi=0.5):
    """Deterministic PyTorch-Linear-style (uniform fan-in) initialization."""
    dims = [node_dim] + list(layer_widths)
    params = []
    for fan_in, fan_out in zip(dims[:-1], dims[1:]):
        key, kw, kb = jax.random.split(key, 3)
        bound = 1.0 / math.sqrt(fan_in)
        params.append(jax.random.uniform(kw, (fan_in, fan_out), jnp.float32,
                                         -bound, bound))
        params.append(jax.random.uniform(kb, (1, fan_out), jnp.float32,
                                         -bound, bound))
    # link_predictor: LazyLinear(out_features=1), bias filled with prior logit
    key, kw = jax.random.split(key)
    bound = 1.0 / math.sqrt(dims[-1])
    wf = jax.random.uniform(kw, (dims[-1], 1), jnp.float32, -bound, bound)
    bf = jnp.full((1, 1), -math.log(1 - pi) + math.log(pi), jnp.float32)
    params.extend([wf, bf])
    return tuple(params)


def reference_forward(x, src, dst, params):
    """Pure-JAX reference matching the PyTorch module (unfused)."""
    w1, b1, w2, b2, wf, bf = params
    h = x[src] * x[dst]
    h = jnp.maximum(h @ w1 + b1, 0.0)
    h = h @ w2 + b2
    return (h @ wf + bf)[:, 0]


if __name__ == "__main__":
    key = jax.random.PRNGKey(0)
    num_nodes, node_dim = 64, 32
    layer_widths = [32, 32]
    num_links = 600   # not a multiple of the tile -> exercises index padding,
                      # and gives a multi-step parallel grid (v7x TCs busy)

    k_x, k_src, k_dst, k_p = jax.random.split(key, 4)
    x = jax.random.normal(k_x, (num_nodes, node_dim), jnp.float32)
    src = jax.random.randint(k_src, (num_links,), 0, num_nodes)
    dst = jax.random.randint(k_dst, (num_links,), 0, num_nodes)
    params = init_params(k_p, node_dim, layer_widths, pi=0.5)

    logits = mlp_link_predictor(x, src, dst, params)
    logits = jax.block_until_ready(logits)

    ref = reference_forward(x, src, dst, params)
    assert logits.shape == (num_links,)
    # W2@Wf pre-fusion + transposed accumulation reassociate fp sums slightly;
    # the in-kernel one-hot gather itself is exact.
    assert jnp.allclose(logits, ref, atol=1e-4, rtol=1e-4)

    print("KERNEL_OK")
</pallas_src>

<mosaic_0001>
module attributes {stable_mosaic.version = 11 : i64} {
  func.func @_mlp_link_kernel(%arg0: i32, %arg1: memref<1x256xi32, #tpu.memory_space<vmem>>, %arg2: memref<1x256xi32, #tpu.memory_space<vmem>>, %arg3: memref<32x64xf32, #tpu.memory_space<vmem>>, %arg4: memref<32x32xf32, #tpu.memory_space<vmem>>, %arg5: memref<32x1xf32, #tpu.memory_space<vmem>>, %arg6: memref<32x1xf32, #tpu.memory_space<vmem>>, %arg7: memref<1xf32, #tpu.memory_space<smem>>, %arg8: memref<1x256xf32, #tpu.memory_space<vmem>>) attributes {dimension_semantics = [#tpu.dimension_semantics<parallel>], iteration_bounds = array<i64: 3>, scalar_prefetch = 0 : i64, scratch_operands = 0 : i64, tpu.core_type = #tpu.core_type<tc>, window_params = [{transform_indices = @transform_0, window_bounds = array<i64: 1, 256>}, {transform_indices = @transform_1, window_bounds = array<i64: 1, 256>}, {pipeline_mode = #tpu.pipeline_mode<synchronous>, transform_indices = @transform_2, window_bounds = array<i64: 32, 64>}, {pipeline_mode = #tpu.pipeline_mode<synchronous>, transform_indices = @transform_3, window_bounds = array<i64: 32, 32>}, {pipeline_mode = #tpu.pipeline_mode<synchronous>, transform_indices = @transform_4, window_bounds = array<i64: 32, 1>}, {pipeline_mode = #tpu.pipeline_mode<synchronous>, transform_indices = @transform_5, window_bounds = array<i64: 32, 1>}, {transform_indices = @transform_6, window_bounds = array<i64: 1>}, {transform_indices = @transform_7, window_bounds = array<i64: 1, 256>}]} {
    %0 = tpu.iota {dimensions = array<i32: 0>} : vector<64x256xi32>
    %c0 = arith.constant 0 : index
    %c0_0 = arith.constant 0 : index
    %1 = vector.load %arg1[%c0, %c0_0] : memref<1x256xi32, #tpu.memory_space<vmem>>, vector<1x256xi32>
    %2 = vector.broadcast %1 : vector<1x256xi32> to vector<64x256xi32>
    %3 = arith.cmpi eq, %0, %2 : vector<64x256xi32>
    %4 = arith.extui %3 : vector<64x256xi1> to vector<64x256xi32>
    %5 = arith.sitofp %4 : vector<64x256xi32> to vector<64x256xf32>
    %c0_1 = arith.constant 0 : index
    %c0_2 = arith.constant 0 : index
    %6 = vector.load %arg2[%c0_1, %c0_2] : memref<1x256xi32, #tpu.memory_space<vmem>>, vector<1x256xi32>
    %7 = vector.broadcast %6 : vector<1x256xi32> to vector<64x256xi32>
    %8 = arith.cmpi eq, %0, %7 : vector<64x256xi32>
    %9 = arith.extui %8 : vector<64x256xi1> to vector<64x256xi32>
    %10 = arith.sitofp %9 : vector<64x256xi32> to vector<64x256xf32>
    %c0_3 = arith.constant 0 : index
    %c0_4 = arith.constant 0 : index
    %11 = vector.load %arg3[%c0_3, %c0_4] : memref<32x64xf32, #tpu.memory_space<vmem>>, vector<32x64xf32>
    %cst = arith.constant dense<0.000000e+00> : vector<32x256xf32>
    %12 = tpu.matmul %11, %5, %cst {dimension_numbers = #tpu.dot_dimension_numbers<[1], [0], [0], [1], [0, 0, 1, 1], [], []>} : vector<32x64xf32>, vector<64x256xf32>, vector<32x256xf32> -> vector<32x256xf32>
    %c0_5 = arith.constant 0 : index
    %c0_6 = arith.constant 0 : index
    %13 = vector.load %arg3[%c0_5, %c0_6] : memref<32x64xf32, #tpu.memory_space<vmem>>, vector<32x64xf32>
    %cst_7 = arith.constant dense<0.000000e+00> : vector<32x256xf32>
    %14 = tpu.matmul %13, %10, %cst_7 {dimension_numbers = #tpu.dot_dimension_numbers<[1], [0], [0], [1], [0, 0, 1, 1], [], []>} : vector<32x64xf32>, vector<64x256xf32>, vector<32x256xf32> -> vector<32x256xf32>
    %15 = arith.mulf %12, %14 : vector<32x256xf32>
    %c0_8 = arith.constant 0 : index
    %c0_9 = arith.constant 0 : index
    %16 = vector.load %arg4[%c0_8, %c0_9] : memref<32x32xf32, #tpu.memory_space<vmem>>, vector<32x32xf32>
    %cst_10 = arith.constant dense<0.000000e+00> : vector<32x256xf32>
    %17 = tpu.matmul %16, %15, %cst_10 {dimension_numbers = #tpu.dot_dimension_numbers<[1], [0], [0], [1], [0, 0, 1, 1], [], []>} : vector<32x32xf32>, vector<32x256xf32>, vector<32x256xf32> -> vector<32x256xf32>
    %c0_11 = arith.constant 0 : index
    %c0_12 = arith.constant 0 : index
    %18 = vector.load %arg5[%c0_11, %c0_12] : memref<32x1xf32, #tpu.memory_space<vmem>>, vector<32x1xf32>
    %19 = vector.broadcast %18 : vector<32x1xf32> to vector<32x256xf32>
    %20 = arith.addf %17, %19 : vector<32x256xf32>
    %cst_13 = arith.constant 0.000000e+00 : f32
    %21 = vector.broadcast %cst_13 : f32 to vector<32x256xf32>
    %22 = arith.maximumf %20, %21 : vector<32x256xf32>
    %c0_14 = arith.constant 0 : index
    %c0_15 = arith.constant 0 : index
    %23 = vector.load %arg6[%c0_14, %c0_15] : memref<32x1xf32, #tpu.memory_space<vmem>>, vector<32x1xf32>
    %24 = vector.broadcast %23 : vector<32x1xf32> to vector<32x256xf32>
    %25 = arith.mulf %22, %24 : vector<32x256xf32>
    %cst_16 = arith.constant dense<0.000000e+00> : vector<256xf32>
    %26 = vector.multi_reduction <add>, %25, %cst_16 [0] : vector<32x256xf32> to vector<256xf32>
    %27 = vector.shape_cast %26 : vector<256xf32> to vector<1x256xf32>
    %c0_17 = arith.constant 0 : index
    %28 = memref.load %arg7[%c0_17] : memref<1xf32, #tpu.memory_space<smem>>
    %29 = vector.broadcast %28 : f32 to vector<1x256xf32>
    %30 = arith.addf %27, %29 : vector<1x256xf32>
    %c0_18 = arith.constant 0 : index
    %c0_19 = arith.constant 0 : index
    %31 = vector.load %arg8[%c0_18, %c0_19] : memref<1x256xf32, #tpu.memory_space<vmem>>, vector<1x256xf32>
    tpu.vector_store %arg8[%c0_18, %c0_19], %30 {strides = array<i32>} : memref<1x256xf32, #tpu.memory_space<vmem>>, vector<1x256xf32>,
    return
  }
  func.func @transform_0(%arg0: i32) -> (i32, i32) {
    %c0_i32 = arith.constant 0 : i32
    %c0_i32_0 = arith.constant 0 : i32
    return %c0_i32, %arg0 : i32, i32
  }
  func.func @transform_1(%arg0: i32) -> (i32, i32) {
    %c0_i32 = arith.constant 0 : i32
    %c0_i32_0 = arith.constant 0 : i32
    return %c0_i32, %arg0 : i32, i32
  }
  func.func @transform_2(%arg0: i32) -> (i32, i32) {
    %c0_i32 = arith.constant 0 : i32
    %c0_i32_0 = arith.constant 0 : i32
    %c0_i32_1 = arith.constant 0 : i32
    return %c0_i32, %c0_i32_0 : i32, i32
  }
  func.func @transform_3(%arg0: i32) -> (i32, i32) {
    %c0_i32 = arith.constant 0 : i32
    %c0_i32_0 = arith.constant 0 : i32
    %c0_i32_1 = arith.constant 0 : i32
    return %c0_i32, %c0_i32_0 : i32, i32
  }
  func.func @transform_4(%arg0: i32) -> (i32, i32) {
    %c0_i32 = arith.constant 0 : i32
    %c0_i32_0 = arith.constant 0 : i32
    %c0_i32_1 = arith.constant 0 : i32
    return %c0_i32, %c0_i32_0 : i32, i32
  }
  func.func @transform_5(%arg0: i32) -> (i32, i32) {
    %c0_i32 = arith.constant 0 : i32
    %c0_i32_0 = arith.constant 0 : i32
    %c0_i32_1 = arith.constant 0 : i32
    return %c0_i32, %c0_i32_0 : i32, i32
  }
  func.func @transform_6(%arg0: i32) -> i32 {
    %c0_i32 = arith.constant 0 : i32
    %c0_i32_0 = arith.constant 0 : i32
    return %c0_i32 : i32
  }
  func.func @transform_7(%arg0: i32) -> (i32, i32) {
    %c0_i32 = arith.constant 0 : i32
    %c0_i32_0 = arith.constant 0 : i32
    return %c0_i32, %arg0 : i32, i32
  }
}

</mosaic_0001>

<bundles_post_ra>
// kernel: mlp_link_predictor.1
= control target key start
LH: loop header
LB: loop body
LE: loop exit
PB: predicated region body
PF: predicated region fallthrough
CT: control target
= control target key end

     0   :  { %s957_s26 = smov 0   ;;  %s1281_s0 = inlined_call_operand.vmem [shape: s32[1,768], index: 0, kind: input, shape index: {}]   ;;  %s1282_s1 = inlined_call_operand.vmem [shape: s32[1,768], index: 1, kind: input, shape index: {}]   ;;  %s1283_s2 = inlined_call_operand.vmem [shape: f32[32,64], index: 2, kind: input, shape index: {}]   ;;  %s1284_s3 = inlined_call_operand.vmem [shape: f32[32,32], index: 3, kind: input, shape index: {}]   ;;  %s1285_s4 = inlined_call_operand.vmem [shape: f32[32,1], index: 4, kind: input, shape index: {}]   ;;  %s1286_s5 = inlined_call_operand.vmem [shape: f32[32,1], index: 5, kind: input, shape index: {}]   ;;  %s1287_s6 = inlined_call_operand.<no memory space> [shape: f32[1], index: 6, kind: input, shape index: {}]   ;;  %s1288_s7 = inlined_call_operand.vmem [shape: f32[1,768], index: 7, kind: output, shape index: {}]  }
   0x1   :  { %12 = sst [smem:[#allocation2]] %s1287_s6 }
   0x2 LB: > { %s777_s27 = sadd.s32 4294967295, %s910_s26   ;;  %p781_p0 = scmp.ge.s32.totalorder %s910_s26, 1  ;;  %s910_s26 = sphi %s957_s26, %s18_s26  }
   0x3   : > { %p248_p1 = scmp.lt.s32.totalorder %s910_s26, 4 }
   0x5   : > { %p249_p2 = pnand %p781_p0, %p248_p1 }
   0x6   : > { %s782_s28 = sshll.u32 (!%p249_p2), %s777_s27, 1  ;;  %s706_s21 = sld [smem:[#allocation2]] (!%p249_p2) }
   0x7   : > { %252 = sbr.rel (%p249_p2) target bundleno = 391 (0x187), region = 48  ;;  %p283_p3 = scmp.lt.s32.totalorder (!%p249_p2), %s782_s28, 5 }
   0xc   : > { %v297_v0 = vlaneseq  ;;  %s1290_s28 = smov (!%p283_p3, %s782_s28), 5  ;;  %v912_v9 = vmov 1.0   ;;  %v410_v16 = vld [vmem:[%s1283_s2 + $0x10] sm:$0xff]  ;;  %v411_v17 = vld [vmem:[%s1283_s2 + $0x18] sm:$0xff]  ;;  %v408_v18 = vld [vmem:[%s1283_s2] sm:$0xff]  ;;  %v913_v26 = vmov 0  }
   0xd   : > { %s285_s30 = scalar_lea.vmem %s1281_s0, %s1290_s28  ;;  %s290_s10 = scalar_lea.vmem %s1282_s1, %s1290_s28  ;;  %v409_v19 = vld [vmem:[%s1283_s2 + $0x8] sm:$0xff]  ;;  %901 = vset.pattern.permute.xlu0 %v913_v26  ;;  %v553_v27 = vld [vmem:[%s1285_s4] sm:$0xff]  ;;  %902 = vset.pattern.permute.xlu1 %v913_v26  ;;  %v555_v30 = vld [vmem:[%s1285_s4 + $0x10] sm:$0xff] }
   0xe   : > { %v966_v1 = vshrl.u32 %v297_v0, 7  ;;  %v306_v4 = vld [vmem:[%s285_s30] sm:$0x3]  ;;  %559 = vperm.xlu0 %901, %v553_v27   ;;  %903 = vset.pattern.permute.xlu2 %v913_v26  ;;  %v554_v31 = vld [vmem:[%s1285_s4 + $0x8] sm:$0xff]  ;;  %v556_v36 = vld [vmem:[%s1285_s4 + $0x18] sm:$0xff]  ;;  %s295_s24 = scalar_lea.vmem %s1288_s7, %s1290_s28 }
   0xf   : > { %v980_v5 = vperm.slane %v306_v4, 0  ;;  %v982_v6 = vperm.slane %v306_v4, 1  ;;  %v357_v13 = vld [vmem:[%s290_s10] sm:$0x3]  ;;  %569 = vperm.xlu1 %902, %v555_v30   ;;  %v658_v37 = vld [vmem:[%s1286_s5 + $0x10] sm:$0xff]  ;;  %v659_v40 = vld [vmem:[%s1286_s5 + $0x18] sm:$0xff] }
  0x10   : > { %v975_v2 = vadd.s32 56, %v966_v1  ;;  %v978_v3 = vadd.s32 48, %v966_v1  ;;  %v985_v7 = vadd.s32 40, %v966_v1  ;;  %v988_v8 = vadd.s32 32, %v966_v1  ;;  %v656_v45 = vld [vmem:[%s1286_s5] sm:$0xff]  ;;  %v657_v53 = vld [vmem:[%s1286_s5 + $0x8] sm:$0xff] }
  0x11   : > { %v1008_v10 = vadd.s32 24, %v966_v1  ;;  %v1024_v11 = vadd.s32 16, %v966_v1  ;;  %v1047_v12 = vadd.s32 8, %v966_v1  ;;  %v1085_v14 = vperm.slane %v357_v13, 0  ;;  %662 = vperm.xlu2 %903, %v656_v45   ;;  %v549_v52 = vld [vmem:[%s1284_s3] sm:$0xff]  ;;  %v550_v54 = vld [vmem:[%s1284_s3 + $0x8] sm:$0xff] }
  0x12   : > { %vm323_vm0 = vcmp.eq.s32.totalorder %v975_v2, %v980_v5  ;;  %vm324_vm1 = vcmp.eq.s32.totalorder %v975_v2, %v982_v6  ;;  %vm321_vm2 = vcmp.eq.s32.totalorder %v978_v3, %v980_v5  ;;  %vm322_vm3 = vcmp.eq.s32.totalorder %v978_v3, %v982_v6  ;;  %v551_v55 = vld [vmem:[%s1284_s3 + $0x10] sm:$0xff]  ;;  %v552_v56 = vld [vmem:[%s1284_s3 + $0x18] sm:$0xff] }
  0x13   : > { %875 = vmatpush.msk.msra.mxu2 %vm323_vm0, %v912_v9  ;;  %883 = vmatpush.msk.msra.mxu3 %vm324_vm1, %v912_v9  ;;  %vm319_vm4 = vcmp.eq.s32.totalorder %v985_v7, %v980_v5  ;;  %vm320_vm5 = vcmp.eq.s32.totalorder %v985_v7, %v982_v6  ;;  %vm317_vm6 = vcmp.eq.s32.totalorder %v988_v8, %v980_v5  ;;  %v1087_v15 = vperm.slane %v357_v13, 1 }
  0x14   : > { %829 = vmatpush.msk.msra.mxu1 %vm324_vm1, %v912_v9  ;;  %vm318_vm7 = vcmp.eq.s32.totalorder %v988_v8, %v982_v6  ;;  %817 = vmatpush.msk.msra.mxu0 %vm323_vm0, %v912_v9  ;;  %vm315_vm8 = vcmp.eq.s32.totalorder %v1008_v10, %v980_v5  ;;  %vm316_vm9 = vcmp.eq.s32.totalorder %v1008_v10, %v982_v6  ;;  %vm412_vm0 = vcmask 523264  }
  0x15   : > { %876 = vmatpush.msk.msra.mxu2 %vm321_vm2, %v912_v9  ;;  %884 = vmatpush.msk.msra.mxu3 %vm322_vm3, %v912_v9  ;;  %vm313_vm10 = vcmp.eq.s32.totalorder %v1024_v11, %v980_v5  ;;  %vm314_vm11 = vcmp.eq.s32.totalorder %v1024_v11, %v982_v6  ;;  %vm311_vm12 = vcmp.eq.s32.totalorder %v1047_v12, %v980_v5 }
  0x16   : > { %830 = vmatpush.msk.msra.mxu1 %vm322_vm3, %v912_v9  ;;  %818 = vmatpush.msk.msra.mxu0 %vm321_vm2, %v912_v9  ;;  %vm312_vm13 = vcmp.eq.s32.totalorder %v1047_v12, %v982_v6  ;;  %vm309_vm14 = vcmp.eq.s32.totalorder %v966_v1, %v980_v5  ;;  %vm310_vm15 = vcmp.eq.s32.totalorder %v966_v1, %v982_v6 }
  0x17   : > { %877 = vmatpush.msk.msra.mxu2 %vm319_vm4, %v912_v9  ;;  %885 = vmatpush.msk.msra.mxu3 %vm320_vm5, %v912_v9  ;;  %vm374_vm1 = vcmp.eq.s32.totalorder %v975_v2, %v1085_v14  ;;  %vm375_vm2 = vcmp.eq.s32.totalorder %v975_v2, %v1087_v15  ;;  %vm372_vm3 = vcmp.eq.s32.totalorder %v978_v3, %v1085_v14 }
  0x18   : > { %831 = vmatpush.msk.msra.mxu1 %vm320_vm5, %v912_v9  ;;  %819 = vmatpush.msk.msra.mxu0 %vm319_vm4, %v912_v9  ;;  %vm373_vm4 = vcmp.eq.s32.totalorder %v978_v3, %v1087_v15  ;;  %vm370_vm5 = vcmp.eq.s32.totalorder %v985_v7, %v1085_v14 }
  0x19   : > { %878 = vmatpush.msk.msra.mxu2 %vm317_vm6, %v912_v9  ;;  %886 = vmatpush.msk.msra.mxu3 %vm318_vm7, %v912_v9 }
  0x1a   : > { %832 = vmatpush.msk.msra.mxu1 %vm318_vm7, %v912_v9  ;;  %820 = vmatpush.msk.msra.mxu0 %vm317_vm6, %v912_v9  ;;  %vm371_vm6 = vcmp.eq.s32.totalorder %v985_v7, %v1087_v15  ;;  %vm368_vm7 = vcmp.eq.s32.totalorder %v988_v8, %v1085_v14 }
  0x1b   : > { %879 = vmatpush.msk.msra.mxu2 %vm315_vm8, %v912_v9  ;;  %887 = vmatpush.msk.msra.mxu3 %vm316_vm9, %v912_v9 }
  0x1c   : > { %833 = vmatpush.msk.msra.mxu1 %vm316_vm9, %v912_v9  ;;  %821 = vmatpush.msk.msra.mxu0 %vm315_vm8, %v912_v9  ;;  %vm369_vm8 = vcmp.eq.s32.totalorder %v988_v8, %v1087_v15  ;;  %vm366_vm9 = vcmp.eq.s32.totalorder %v1008_v10, %v1085_v14 }
  0x1d   : > { %880 = vmatpush.msk.msra.mxu2 %vm313_vm10, %v912_v9  ;;  %888 = vmatpush.msk.msra.mxu3 %vm314_vm11, %v912_v9 }
  0x1e   : > { %834 = vmatpush.msk.msra.mxu1 %vm314_vm11, %v912_v9  ;;  %822 = vmatpush.msk.msra.mxu0 %vm313_vm10, %v912_v9  ;;  %vm367_vm10 = vcmp.eq.s32.totalorder %v1008_v10, %v1087_v15  ;;  %vm364_vm11 = vcmp.eq.s32.totalorder %v1024_v11, %v1085_v14 }
  0x1f   : > { %881 = vmatpush.msk.msra.mxu2 %vm311_vm12, %v912_v9  ;;  %889 = vmatpush.msk.msra.mxu3 %vm312_vm13, %v912_v9 }
  0x20   : > { %835 = vmatpush.msk.msra.mxu1 %vm312_vm13, %v912_v9  ;;  %823 = vmatpush.msk.msra.mxu0 %vm311_vm12, %v912_v9  ;;  %vm365_vm12 = vcmp.eq.s32.totalorder %v1024_v11, %v1087_v15  ;;  %vm362_vm13 = vcmp.eq.s32.totalorder %v1047_v12, %v1085_v14 }
  0x21   : > { %882 = vmatpush.msk.msra.mxu2 %vm309_vm14, %v912_v9  ;;  %890 = vmatpush.msk.msra.mxu3 %vm310_vm15, %v912_v9 }
  0x22   : > { %827 = vmatmul.msk.f32.vlgmr.msra.gmra.mxu2 %vm412_vm0, %v410_v16  ;;  %839 = vmatmul.msk.f32.vlgmr.msra.gmra.mxu3 %vm412_vm0, %v410_v16 }
  0x23   : > { %841 = vmatpush.msk.msrb.mxu2 %vm374_vm1, %v912_v9  ;;  %853 = vmatpush.msk.msrb.mxu3 %vm375_vm2, %v912_v9  ;;  %vm361_vm1 = vcmp.eq.s32.totalorder %v966_v1, %v1087_v15  ;;  %vm713_vm2 = vcmask 1040384  }
  0x24   : > { %836 = vmatpush.msk.msra.mxu1 %vm310_vm15, %v912_v9  ;;  %824 = vmatpush.msk.msra.mxu0 %vm309_vm14, %v912_v9  ;;  %vm363_vm14 = vcmp.eq.s32.totalorder %v1047_v12, %v1087_v15  ;;  %vm360_vm15 = vcmp.eq.s32.totalorder %v966_v1, %v1085_v14 }
  0x25   : > { %842 = vmatpush.msk.msrb.mxu2 %vm372_vm3, %v912_v9  ;;  %854 = vmatpush.msk.msrb.mxu3 %vm373_vm4, %v912_v9  ;;  %vm718_vm3 = vcmp.lt.s32.totalorder %v297_v0, 256 }
  0x26   : > { %837 = vmatmul.msk.f32.vlgmr.msra.gmra.mxu1 %vm412_vm0, %v408_v18  ;;  %825 = vmatmul.msk.f32.vlgmr.msra.gmra.mxu0 %vm412_vm0, %v408_v18 }
  0x27   : > { %843 = vmatpush.msk.msrb.mxu2 %vm370_vm5, %v912_v9  ;;  %855 = vmatpush.msk.msrb.mxu3 %vm371_vm6, %v912_v9 }
  0x28   : > { %564 = vperm.xlu0 %901, %v554_v31   ;;  %574 = vperm.xlu1 %902, %v556_v36  }
  0x29   : > { %844 = vmatpush.msk.msrb.mxu2 %vm368_vm7, %v912_v9  ;;  %856 = vmatpush.msk.msrb.mxu3 %vm369_vm8, %v912_v9 }
  0x2a   : > { %828 = vmatmul.msk.f32.gmra.mxu2 %vm412_vm0, %v411_v17  ;;  %840 = vmatmul.msk.f32.gmra.mxu3 %vm412_vm0, %v411_v17 }
  0x2b   : > { %845 = vmatpush.msk.msrb.mxu2 %vm366_vm9, %v912_v9  ;;  %857 = vmatpush.msk.msrb.mxu3 %vm367_vm10, %v912_v9 }
  0x2c   : > { %667 = vperm.xlu2 %903, %v657_v53  }
  0x2d   : > { %846 = vmatpush.msk.msrb.mxu2 %vm364_vm11, %v912_v9  ;;  %858 = vmatpush.msk.msrb.mxu3 %vm365_vm12, %v912_v9 }
  0x2e   : > { %838 = vmatmul.msk.f32.gmra.mxu1 %vm412_vm0, %v409_v19  ;;  %826 = vmatmul.msk.f32.gmra.mxu0 %vm412_vm0, %v409_v19 }
  0x2f   : > { %847 = vmatpush.msk.msrb.mxu2 %vm362_vm13, %v912_v9  ;;  %859 = vmatpush.msk.msrb.mxu3 %vm363_vm14, %v912_v9 }
  0x30   : > { %672 = vperm.xlu0 %901, %v658_v37   ;;  %677 = vperm.xlu1 %902, %v659_v40  }
  0x31   : > { %848 = vmatpush.msk.msrb.mxu2 %vm360_vm15, %v912_v9  ;;  %860 = vmatpush.msk.msrb.mxu3 %vm361_vm1, %v912_v9 }
  0x32   : > { %849 = vmatmul.msk.f32.vlgmr.msrb.gmra.mxu2 %vm412_vm0, %v408_v18  ;;  %861 = vmatmul.msk.f32.vlgmr.msrb.gmra.mxu3 %vm412_vm0, %v408_v18 }
  0x3a   : > { %850 = vmatmul.msk.f32.gmra.mxu2 %vm412_vm0, %v409_v19  ;;  %862 = vmatmul.msk.f32.gmra.mxu3 %vm412_vm0, %v409_v19 }
  0x42   : > { %851 = vmatmul.msk.f32.gmra.mxu2 %vm412_vm0, %v410_v16  ;;  %863 = vmatmul.msk.f32.gmra.mxu3 %vm412_vm0, %v410_v16 }
  0x4a   : > { %852 = vmatmul.msk.f32.gmra.mxu2 %vm412_vm0, %v411_v17  ;;  %864 = vmatmul.msk.f32.gmra.mxu3 %vm412_vm0, %v411_v17  ;;  %vm577_vm0 = vcmask 261120  }
  0x6b   : > { %v663_v63 = vpop.permute.xlu2 %662 }
  0x80   : > { %v560_v59 = vpop.permute.xlu0 %559 }
  0x81   : > { %v570_v60 = vpop.permute.xlu1 %569 }
  0x86   : > { %v668_v15 = vpop.permute.xlu2 %667 }
  0x9a   : > { %v565_v1 = vpop.permute.xlu0 %564  ;;  %v575_v10 = vpop.permute.xlu1 %574 }
  0xa3   : > { %v471_v32 = vpop.f32.mrf.mxu1  ;;  %v442_v33 = vpop.f32.mrf.mxu0 }
  0xa5   : > { %v448_v20 = vpop.f32.mrf.mxu2  ;;  %v477_v21 = vpop.f32.mrf.mxu3 }
  0xab   : > { %v474_v43 = vpop.f32.mrf.mxu1  ;;  %v445_v44 = vpop.f32.mrf.mxu0 }
  0xad   : > { %v451_v22 = vpop.f32.mrf.mxu2  ;;  %v480_v23 = vpop.f32.mrf.mxu3 }
  0xb5   : > { %v500_v24 = vpop.f32.mrf.mxu2  ;;  %v529_v25 = vpop.f32.mrf.mxu3 }
  0xb6   : > { %v542_v50 = vmul.f32 %v529_v25, %v471_v32  ;;  %v541_v51 = vmul.f32 %v500_v24, %v442_v33  ;;  %v678_v33 = vpop.permute.xlu1 %677 }
  0xbd   : > { %v503_v28 = vpop.f32.mrf.mxu2  ;;  %v532_v29 = vpop.f32.mrf.mxu3 }
  0xbe   : > { %v544_v48 = vmul.f32 %v532_v29, %v474_v43  ;;  %v543_v49 = vmul.f32 %v503_v28, %v445_v44 }
  0xc5   : > { %v506_v34 = vpop.f32.mrf.mxu2  ;;  %v535_v35 = vpop.f32.mrf.mxu3 }
  0xc6   : > { %v545_v46 = vmul.f32 %v506_v34, %v448_v20  ;;  %v546_v47 = vmul.f32 %v535_v35, %v477_v21  ;;  %v673_v20 = vpop.permute.xlu0 %672 }
  0xcd   : > { %v509_v38 = vpop.f32.mrf.mxu2  ;;  %v538_v39 = vpop.f32.mrf.mxu3 }
  0xce   : > { %v547_v41 = vmul.f32 %v509_v38, %v451_v22  ;;  %v548_v42 = vmul.f32 %v538_v39, %v480_v23 }
  0xd0   : > { %602 = vmatpush.msrb.mxu0 %v547_v41  ;;  %631 = vmatpush.msrb.mxu1 %v548_v42 }
  0xd2   : > { %603 = vmatpush.msrb.mxu0 %v545_v46  ;;  %632 = vmatpush.msrb.mxu1 %v546_v47 }
  0xd4   : > { %604 = vmatpush.msrb.mxu0 %v543_v49  ;;  %633 = vmatpush.msrb.mxu1 %v544_v48 }
  0xd6   : > { %605 = vmatpush.msrb.mxu0 %v541_v51  ;;  %634 = vmatpush.msrb.mxu1 %v542_v50  ;;  %v707_v50 = vstv %s706_s21 }
  0xd7   : > { %865 = vmatmul.msk.f32.vlgmr.msrb.gmra.mxu0 %vm577_vm0, %v549_v52  ;;  %869 = vmatmul.msk.f32.vlgmr.msrb.gmra.mxu1 %vm577_vm0, %v549_v52 }
  0xdf   : > { %866 = vmatmul.msk.f32.gmra.mxu0 %vm577_vm0, %v550_v54  ;;  %870 = vmatmul.msk.f32.gmra.mxu1 %vm577_vm0, %v550_v54 }
  0xe7   : > { %867 = vmatmul.msk.f32.gmra.mxu0 %vm577_vm0, %v551_v55  ;;  %871 = vmatmul.msk.f32.gmra.mxu1 %vm577_vm0, %v551_v55 }
  0xef   : > { %868 = vmatmul.msk.f32.gmra.mxu0 %vm577_vm0, %v552_v56  ;;  %872 = vmatmul.msk.f32.gmra.mxu1 %vm577_vm0, %v552_v56 }
 0x154   : > { %v607_v57 = vpop.f32.mrf.mxu0  ;;  %v636_v58 = vpop.f32.mrf.mxu1 }
 0x155   : > { %v608_v4 = vadd.f32 %v607_v57, %v560_v59  ;;  %v637_v5 = vadd.f32 %v636_v58, %v560_v59 }
 0x157   : > { %v648_v13 = vmax.f32 %v608_v4, 0.0  ;;  %v649_v14 = vmax.f32 %v637_v5, 0.0 }
 0x159   : > { %v680_v21 = vmul.f32 %v663_v63, %v648_v13  ;;  %v681_v22 = vmul.f32 %v663_v63, %v649_v14 }
 0x15c   : > { %v610_v61 = vpop.f32.mrf.mxu0  ;;  %v639_v62 = vpop.f32.mrf.mxu1 }
 0x15d   : > { %v611_v2 = vadd.f32 %v610_v61, %v565_v1  ;;  %v640_v3 = vadd.f32 %v639_v62, %v565_v1 }
 0x15f   : > { %v650_v11 = vmax.f32 %v611_v2, 0.0  ;;  %v651_v12 = vmax.f32 %v640_v3, 0.0 }
 0x161   : > { %v682_v18 = vmul.f32 %v668_v15, %v650_v11  ;;  %v683_v19 = vmul.f32 %v668_v15, %v651_v12 }
 0x163   : > { %v688_v29 = vadd.f32 %v682_v18, %v680_v21  ;;  %v697_v30 = vadd.f32 %v683_v19, %v681_v22 }
 0x164   : > { %v613_v6 = vpop.f32.mrf.mxu0  ;;  %v642_v7 = vpop.f32.mrf.mxu1 }
 0x165   : > { %v614_v8 = vadd.f32 %v613_v6, %v570_v60  ;;  %v643_v9 = vadd.f32 %v642_v7, %v570_v60 }
 0x167   : > { %v652_v16 = vmax.f32 %v614_v8, 0.0  ;;  %v653_v17 = vmax.f32 %v643_v9, 0.0 }
 0x169   : > { %v684_v25 = vmul.f32 %v673_v20, %v652_v16  ;;  %v685_v26 = vmul.f32 %v673_v20, %v653_v17 }
 0x16b   : > { %v689_v34 = vadd.f32 %v688_v29, %v684_v25  ;;  %v698_v35 = vadd.f32 %v697_v30, %v685_v26 }
 0x16c   : > { %v616_v23 = vpop.f32.mrf.mxu0  ;;  %v645_v24 = vpop.f32.mrf.mxu1 }
 0x16d   : > { %v617_v27 = vadd.f32 %v616_v23, %v575_v10  ;;  %v646_v28 = vadd.f32 %v645_v24, %v575_v10 }
 0x16f   : > { %v654_v31 = vmax.f32 %v617_v27, 0.0  ;;  %v655_v32 = vmax.f32 %v646_v28, 0.0 }
 0x171   : > { %v686_v36 = vmul.f32 %v678_v33, %v654_v31  ;;  %v687_v37 = vmul.f32 %v678_v33, %v655_v32 }
 0x173   : > { %v690_v38 = vadd.f32 %v689_v34, %v686_v36  ;;  %v699_v39 = vadd.f32 %v698_v35, %v687_v37 }
 0x175   : > { %v691_v40 = vrot.slane %v690_v38, 4  ;;  %v700_v41 = vrot.slane %v699_v39, 4 }
 0x177   : > { %v692_v42 = vadd.f32 %v691_v40, %v690_v38  ;;  %v701_v43 = vadd.f32 %v700_v41, %v699_v39 }
 0x179   : > { %v693_v44 = vrot.slane %v692_v42, 2  ;;  %v702_v45 = vrot.slane %v701_v43, 2 }
 0x17b   : > { %v694_v46 = vadd.f32 %v693_v44, %v692_v42  ;;  %v703_v47 = vadd.f32 %v702_v45, %v701_v43 }
 0x17d   : > { %v695_v48 = vrot.slane %v694_v46, 1  ;;  %v704_v49 = vrot.slane %v703_v47, 1 }
 0x17f   : > { %v696_v51 = vadd.f32 %v695_v48, %v694_v46  ;;  %v705_v52 = vadd.f32 %v704_v49, %v703_v47 }
 0x181   : > { %v709_v53 = vadd.f32 %v707_v50, %v705_v52  ;;  %v708_v54 = vadd.f32 %v707_v50, %v696_v51 }
 0x183   : > { %v712_v55 = vrot.slane %v709_v53, 7 }
 0x185   : > { %v714_v56 = vsel %vm713_vm2, %v708_v54, %v712_v55 }
 0x186   : > { %720 = vst.msk [vmem:[%s295_s24] sm:$0x3] %vm718_vm3, %v714_v56 }
 0x187 PF: > { %s18_s26 = sadd.s32 1, %s910_s26  }
 0x188   : > { %p15_p4 = scmp.ge.s32.totalorder %s18_s26, 5  }
 0x18a   :  { %17 = sbr.rel (!%p15_p4) target bundleno = 2 (0x2), region = 81 }

</bundles_post_ra>
